<compile_context>
chip_gen: v5e
topology: v5e:2x2
jax: 0.10.0
libtpu: 0.0.40
codegen_flags: <defaults>
</compile_context>

<pallas_src>
import functools

import jax
import jax.numpy as jnp
from jax.experimental import pallas as pl
from jax.experimental.pallas import tpu as pltpu


def _gumbel_softmax_kernel(temp_ref, logits_ref, u_ref, y_ref, y_hard_ref=None,
                           *, hard: bool, return_max_id: bool, n_class: int):
    logits = logits_ref[...].astype(jnp.float32)
    u = u_ref[...]

    # Gumbel noise: -log(-log(u + eps) + eps), eps = 1e-20 as in the module.
    eps = 1e-20
    g = -jnp.log(-jnp.log(u + eps) + eps)

    # (logits + noise) / temperature  ->  scalar reciprocal + broadcast multiply.
    inv_temp = 1.0 / temp_ref[0]
    z = (logits + g) * inv_temp
    z_max = jnp.max(z, axis=-1, keepdims=True)

    need_idx = hard or return_max_id
    if need_idx:
        # argmax(softmax(z)) == argmax(z); first index among ties (torch.max semantics).
        lane_idx = jax.lax.broadcasted_iota(jnp.int32, z.shape, 1)
        idx = jnp.min(jnp.where(z == z_max, lane_idx, n_class),
                      axis=-1, keepdims=True)
        if return_max_id:
            y_hard_ref[...] = idx

    if hard:
        # scatter_(-1, y_hard, 1.0) onto zeros == one-hot of the argmax.
        # Softmax (exp / row-sum / divide) is skipped entirely in this mode.
        y_ref[...] = (lane_idx == idx).astype(y_ref.dtype)
    else:
        e = jnp.exp(z - z_max)
        denom = jnp.sum(e, axis=-1, keepdims=True)
        y_ref[...] = (e * (1.0 / denom)).astype(y_ref.dtype)


def _choose_tile_b(B, N, dtype):
    """Pick the largest batch tile that keeps pipelined VMEM usage v7x-safe."""
    itemsize = jnp.dtype(dtype).itemsize
    # Double-buffered inputs (logits + uniform) and output (y), plus f32
    # elementwise temporaries inside the kernel.
    per_row = 2 * (N * itemsize + N * 4 + N * itemsize) + 4 * N * 4
    budget = 24 * 1024 * 1024  # conservative: fits v7x's 64 MiB physical / 32 MiB scoped VMEM
    tile = min(B, max(8, budget // max(per_row, 1)))
    if tile < B:
        tile = max(8, (tile // 8) * 8)   # keep sublane alignment for partial tiling
    return tile


def gumbel_connector_forward(logits, temperature, *, key=None,
                             hard=False, return_max_id=False):
    """JAX/Pallas equivalent of GumbelConnector.forward.

    logits: [batch, n_class] float array (any float dtype; math runs in f32)
    temperature: non-negative scalar (runtime value, not baked into the kernel)
    key: jax.random key used for the Gumbel noise (deterministic given key)
    Returns y [batch, n_class] in logits.dtype
    (and y_hard [batch, 1] int32 if return_max_id).
    """
    B, N = logits.shape
    if key is None:
        key = jax.random.PRNGKey(0)
    u = jax.random.uniform(key, (B, N), dtype=jnp.float32)

    tile_b = _choose_tile_b(B, N, logits.dtype)
    grid = (pl.cdiv(B, tile_b),)

    out_shape = [jax.ShapeDtypeStruct((B, N), logits.dtype)]
    out_specs = [pl.BlockSpec((tile_b, N), lambda i: (i, 0))]
    if return_max_id:
        out_shape.append(jax.ShapeDtypeStruct((B, 1), jnp.int32))
        out_specs.append(pl.BlockSpec((tile_b, 1), lambda i: (i, 0)))

    kernel = functools.partial(_gumbel_softmax_kernel, hard=hard,
                               return_max_id=return_max_id, n_class=N)

    results = pl.pallas_call(
        kernel,
        grid=grid,
        out_shape=tuple(out_shape),
        in_specs=[
            pl.BlockSpec(memory_space=pltpu.MemorySpace.SMEM),       # temperature
            pl.BlockSpec((tile_b, N), lambda i: (i, 0)),             # logits
            pl.BlockSpec((tile_b, N), lambda i: (i, 0)),             # uniform noise
        ],
        out_specs=tuple(out_specs),
        compiler_params=pltpu.CompilerParams(
            dimension_semantics=("parallel",),          # megacore batch split on v7x
            vmem_limit_bytes=48 * 1024 * 1024,
        ),
    )(jnp.asarray([temperature], jnp.float32), logits, u)

    if return_max_id:
        return results[0], results[1]
    return results[0]


if __name__ == "__main__":
    # GumbelConnector has no learnable parameters; only logits are needed.
    key = jax.random.PRNGKey(0)
    k_logits, k_noise = jax.random.split(key)
    batch, n_class = 8, 128
    logits = jax.random.normal(k_logits, (batch, n_class), dtype=jnp.float32)
    temperature = 0.8

    # Soft sample (default path: hard=False, return_max_id=False).
    y = gumbel_connector_forward(logits, temperature, key=k_noise)
    y = jax.block_until_ready(y)

    # Soft sample with max ids (return_max_id=True path).
    y_soft2, y_soft_id = gumbel_connector_forward(
        logits, temperature, key=k_noise, hard=False, return_max_id=True)
    y_soft2 = jax.block_until_ready(y_soft2)
    y_soft_id = jax.block_until_ready(y_soft_id)

    # Hard sample with max ids (hard=True, return_max_id=True path).
    y_hard_onehot, y_hard_id = gumbel_connector_forward(
        logits, temperature, key=k_noise, hard=True, return_max_id=True)
    y_hard_onehot = jax.block_until_ready(y_hard_onehot)
    y_hard_id = jax.block_until_ready(y_hard_id)

    # Sanity checks: soft rows sum to 1, hard rows are valid one-hots, and all
    # argmax ids agree (same noise key -> same Gumbel noise across calls).
    assert y.shape == (batch, n_class)
    assert jnp.allclose(jnp.sum(y, axis=-1), 1.0, atol=1e-5)
    assert jnp.allclose(y, y_soft2, atol=0.0)
    assert y_hard_onehot.shape == (batch, n_class)
    assert y_hard_id.shape == (batch, 1)
    assert jnp.all(jnp.sum(y_hard_onehot, axis=-1) == 1.0)
    assert jnp.all(jnp.argmax(y_hard_onehot, axis=-1)[:, None] == y_hard_id)
    assert jnp.all(jnp.argmax(y, axis=-1)[:, None] == y_hard_id)
    assert jnp.all(y_soft_id == y_hard_id)

    print("KERNEL_OK")
</pallas_src>

<mosaic_0001>
module attributes {stable_mosaic.version = 11 : i64} {
  func.func @_gumbel_softmax_kernel(%arg0: i32, %arg1: memref<1xf32, #tpu.memory_space<smem>>, %arg2: memref<8x128xf32, #tpu.memory_space<vmem>>, %arg3: memref<8x128xf32, #tpu.memory_space<vmem>>, %arg4: memref<8x128xf32, #tpu.memory_space<vmem>>) attributes {dimension_semantics = [#tpu.dimension_semantics<parallel>], iteration_bounds = array<i64: 1>, scalar_prefetch = 0 : i64, scratch_operands = 0 : i64, tpu.core_type = #tpu.core_type<tc>, window_params = [{transform_indices = @transform_0, window_bounds = array<i64: 1>}, {transform_indices = @transform_1, window_bounds = array<i64: 8, 128>}, {transform_indices = @transform_2, window_bounds = array<i64: 8, 128>}, {transform_indices = @transform_3, window_bounds = array<i64: 8, 128>}]} {
    %c0 = arith.constant 0 : index
    %c0_0 = arith.constant 0 : index
    %0 = vector.load %arg2[%c0, %c0_0] : memref<8x128xf32, #tpu.memory_space<vmem>>, vector<8x128xf32>
    %c0_1 = arith.constant 0 : index
    %c0_2 = arith.constant 0 : index
    %1 = vector.load %arg3[%c0_1, %c0_2] : memref<8x128xf32, #tpu.memory_space<vmem>>, vector<8x128xf32>
    %cst = arith.constant 9.99999968E-21 : f32
    %2 = vector.broadcast %cst : f32 to vector<8x128xf32>
    %3 = arith.addf %1, %2 : vector<8x128xf32>
    %4 = math.log %3 : vector<8x128xf32>
    %cst_3 = arith.constant 0.000000e+00 : f32
    %5 = vector.broadcast %cst_3 : f32 to vector<8x128xf32>
    %6 = arith.subf %5, %4 : vector<8x128xf32>
    %cst_4 = arith.constant 9.99999968E-21 : f32
    %7 = vector.broadcast %cst_4 : f32 to vector<8x128xf32>
    %8 = arith.addf %6, %7 : vector<8x128xf32>
    %9 = math.log %8 : vector<8x128xf32>
    %cst_5 = arith.constant 0.000000e+00 : f32
    %10 = vector.broadcast %cst_5 : f32 to vector<8x128xf32>
    %11 = arith.subf %10, %9 : vector<8x128xf32>
    %c0_6 = arith.constant 0 : index
    %12 = memref.load %arg1[%c0_6] : memref<1xf32, #tpu.memory_space<smem>>
    %cst_7 = arith.constant 1.000000e+00 : f32
    %13 = arith.divf %cst_7, %12 : f32
    %14 = arith.addf %0, %11 : vector<8x128xf32>
    %15 = vector.broadcast %13 : f32 to vector<8x128xf32>
    %16 = arith.mulf %14, %15 : vector<8x128xf32>
    %cst_8 = arith.constant dense<0xFF800000> : vector<8xf32>
    %17 = vector.multi_reduction <maximumf>, %16, %cst_8 [1] : vector<8x128xf32> to vector<8xf32>
    %18 = vector.shape_cast %17 : vector<8xf32> to vector<8x1xf32>
    %19 = vector.broadcast %18 : vector<8x1xf32> to vector<8x128xf32>
    %20 = arith.subf %16, %19 : vector<8x128xf32>
    %21 = math.exp %20 : vector<8x128xf32>
    %cst_9 = arith.constant dense<0.000000e+00> : vector<8xf32>
    %22 = vector.multi_reduction <add>, %21, %cst_9 [1] : vector<8x128xf32> to vector<8xf32>
    %23 = vector.shape_cast %22 : vector<8xf32> to vector<8x1xf32>
    %cst_10 = arith.constant 1.000000e+00 : f32
    %24 = vector.broadcast %cst_10 : f32 to vector<8x1xf32>
    %25 = arith.divf %24, %23 : vector<8x1xf32>
    %26 = vector.broadcast %25 : vector<8x1xf32> to vector<8x128xf32>
    %27 = arith.mulf %21, %26 : vector<8x128xf32>
    %c0_11 = arith.constant 0 : index
    %c0_12 = arith.constant 0 : index
    %28 = vector.load %arg4[%c0_11, %c0_12] : memref<8x128xf32, #tpu.memory_space<vmem>>, vector<8x128xf32>
    tpu.vector_store %arg4[%c0_11, %c0_12], %27 {strides = array<i32>} : memref<8x128xf32, #tpu.memory_space<vmem>>, vector<8x128xf32>,
    return
  }
  func.func @transform_0(%arg0: i32) -> i32 {
    %c0_i32 = arith.constant 0 : i32
    %c0_i32_0 = arith.constant 0 : i32
    return %c0_i32 : i32
  }
  func.func @transform_1(%arg0: i32) -> (i32, i32) {
    %c0_i32 = arith.constant 0 : i32
    %c0_i32_0 = arith.constant 0 : i32
    return %arg0, %c0_i32 : i32, i32
  }
  func.func @transform_2(%arg0: i32) -> (i32, i32) {
    %c0_i32 = arith.constant 0 : i32
    %c0_i32_0 = arith.constant 0 : i32
    return %arg0, %c0_i32 : i32, i32
  }
  func.func @transform_3(%arg0: i32) -> (i32, i32) {
    %c0_i32 = arith.constant 0 : i32
    %c0_i32_0 = arith.constant 0 : i32
    return %arg0, %c0_i32 : i32, i32
  }
}

</mosaic_0001>

<bundles_post_ra>
// kernel: tpu_custom_call.1
= control target key start
LH: loop header
LB: loop body
LE: loop exit
PB: predicated region body
PF: predicated region fallthrough
CT: control target
= control target key end

     0   :  { %9 = vsyncpa [#allocation4], 0  ;;  %s244_s0 = inlined_call_operand.<no memory space> [shape: f32[1], index: 0, kind: input, shape index: {}]   ;;  %s245_s1 = inlined_call_operand.hbm [shape: f32[8,128], index: 1, kind: input, shape index: {}]   ;;  %s246_s2 = inlined_call_operand.hbm [shape: f32[8,128], index: 2, kind: input, shape index: {}]   ;;  %s247_s3 = inlined_call_operand.hbm [shape: f32[8,128], index: 3, kind: output, shape index: {}]  }
   0x1   :  { %10 = vsyncpa [#allocation7], 0 }
   0x2   :  { %11 = vsyncpa [#allocation5], 0  ;;  %s19_s14 = sshll.u32 %s245_s1, 4  ;;  %s209_s15 = smov [#allocation3]   ;;  %s20_s14 = int_to_ptr.hbm [resolvable:$true] %s19_s14 }
   0x3   :  { %s21_s16 = sshll.u32 %s209_s15, 4  ;;  %s30_s19 = sshll.u32 %s246_s2, 4  ;;  %s22_s16 = int_to_ptr.vmem [resolvable:$true] %s21_s16  ;;  %s31_s19 = int_to_ptr.hbm [resolvable:$true] %s30_s19 }
   0x4   :  { %24 = dma.hbm_to_vmem [thread:$0]  %s20_s14, 128, %s22_s16, [#allocation4]  }
   0x5   :  { %s210_s20 = smov [#allocation6]  }
   0x6   :  { %s32_s21 = sshll.u32 %s210_s20, 4  ;;  %s33_s21 = int_to_ptr.vmem [resolvable:$true] %s32_s21 }
   0x7   :  { %35 = dma.hbm_to_vmem [thread:$0]  %s31_s19, 128, %s33_s21, [#allocation7]  }
   0x8   :  { %203 = dma.done.wait [#allocation4], 128  }
   0x9   :  { %204 = vsyncadd [#allocation4], 4294967168  ;;  %v55_v0 = vstv %s244_s0 }
   0xa   :  { %205 = dma.done.wait [#allocation7], 128  }
   0xb   :  { %206 = vsyncadd [#allocation7], 4294967168  ;;  %121 = vrcp.f32 %v55_v0  ;;  %v67_v3 = vand.u32 2147483648, %v55_v0  ;;  %vm61_vm0 = vweird.f32 %v55_v0  ;;  %v65_v5 = vand.u32 2147483647, %v55_v0  ;;  %v45_v11 = vld [vmem:[#allocation6] sm:$0xff] }
   0xc   :  { %v46_v12 = vadd.f32 1e-20, %v45_v11  ;;  %v44_v20 = vld [vmem:[#allocation3] sm:$0xff]  ;;  %s211_s1 = smov [#allocation8]   ;;  %s105_s26 = sshll.u32 %s247_s3, 4  ;;  %s106_s26 = int_to_ptr.hbm [resolvable:$true] %s105_s26 }
   0xd   :  { %v68_v7 = vor.u32 1.1754944e-38, %v67_v3  ;;  %vm66_vm3 = vcmp.eq.f32.partialorder %v65_v5, 8.507059e+37  ;;  %s103_s2 = sshll.u32 %s211_s1, 4  ;;  %s104_s2 = int_to_ptr.vmem [resolvable:$true] %s103_s2 }
   0xe   :  { %123 = vlog2.f32 %v46_v12 }
  0x11   :  { %v122_v1 = vpop.eup %121 }
  0x12   :  { %v57_v2 = vmul.f32 %v122_v1, %v55_v0  ;;  %vm62_vm1 = vweird.f32 %v122_v1 }
  0x13   :  { %vm63_vm2 = vmor %vm61_vm0, %vm62_vm1 }
  0x14   :  { %v58_v4 = vsub.f32 1.0, %v57_v2  ;;  %v124_v13 = vpop.eup %123 }
  0x15   :  { %v48_v14 = vmul.f32 0.6931472, %v124_v13 }
  0x16   :  { %v59_v6 = vmul.f32 %v122_v1, %v58_v4 }
  0x17   :  { %v49_v15 = vsub.f32 0.0, %v48_v14 }
  0x18   :  { %v60_v8 = vadd.f32 %v122_v1, %v59_v6 }
  0x19   :  { %v50_v16 = vadd.f32 1e-20, %v49_v15 }
  0x1a   :  { %v64_v9 = vsel %vm63_vm2, %v122_v1, %v60_v8 }
  0x1b   :  { %v69_v10 = vsel %vm66_vm3, %v68_v7, %v64_v9  ;;  %125 = vlog2.f32 %v50_v16 }
  0x1c   :  { %116 = vpush %v69_v10 }
  0x21   :  { %v126_v17 = vpop.eup %125 }
  0x22   :  { %v52_v18 = vmul.f32 0.6931472, %v126_v17 }
  0x24   :  { %v53_v19 = vsub.f32 0.0, %v52_v18 }
  0x26   :  { %v71_v21 = vadd.f32 %v53_v19, %v44_v20 }
  0x4d   :  { %s117_s0 = spop %116 }
  0x4e   :  { %v72_v22 = vstv %s117_s0 }
  0x4f   :  { %v73_v23 = vmul.f32 %v72_v22, %v71_v21 }
  0x51   :  { %74 = vmax.xlane.f32.xlu0 %v73_v23 }
  0xc4   :  { %v75_v24 = vpop.xlane.xlu0 %74 }
  0xc5   :  { %v76_v25 = vsub.f32 %v73_v23, %v75_v24 }
  0xc7   :  { %v77_v26 = vmul.f32 1.442695, %v76_v25 }
  0xc9   :  { %127 = vpow2.f32 %v77_v26 }
  0xcf   :  { %v128_v27 = vpop.eup %127 }
  0xd0   :  { %79 = vadd.xlane.f32.xlu0 %v128_v27 }
 0x143   :  { %v80_v28 = vpop.xlane.xlu0 %79 }
 0x144   :  { %129 = vrcp.f32 %v80_v28  ;;  %v92_v32 = vand.u32 2147483648, %v80_v28  ;;  %v90_v34 = vand.u32 2147483647, %v80_v28  ;;  %vm86_vm5 = vweird.f32 %v80_v28 }
 0x146   :  { %v93_v36 = vor.u32 1.1754944e-38, %v92_v32  ;;  %vm91_vm7 = vcmp.eq.f32.partialorder %v90_v34, 8.507059e+37 }
 0x14a   :  { %v130_v29 = vpop.eup %129 }
 0x14b   :  { %v82_v30 = vmul.f32 %v130_v29, %v80_v28  ;;  %vm87_vm4 = vweird.f32 %v130_v29 }
 0x14c   :  { %vm88_vm6 = vmor %vm86_vm5, %vm87_vm4 }
 0x14d   :  { %v83_v31 = vsub.f32 1.0, %v82_v30 }
 0x14f   :  { %v84_v33 = vmul.f32 %v130_v29, %v83_v31 }
 0x151   :  { %v85_v35 = vadd.f32 %v130_v29, %v84_v33 }
 0x153   :  { %v89_v37 = vsel %vm88_vm6, %v130_v29, %v85_v35 }
 0x154   :  { %v94_v38 = vsel %vm91_vm7, %v93_v36, %v89_v37 }
 0x155   :  { %v96_v39 = vmul.f32 %v128_v27, %v94_v38 }
 0x157   :  { %97 = vst [vmem:[#allocation8] sm:$0xff] %v96_v39 }
 0x158   :  { %108 = dma.vmem_to_hbm [thread:$0]  %s104_s2, 128, %s106_s26, [#allocation5]  }
 0x159   :  { %207 = dma.done.wait [#allocation5], 128  }
 0x15a   :  { %208 = vsyncadd [#allocation5], 4294967168 }
 0x15b   :  { %113 = vsyncpa [#allocation4], 1 }
 0x15c   :  { %114 = vsyncpa [#allocation7], 1 }
 0x15d   :  { %115 = vsyncpa [#allocation5], 1 }

</bundles_post_ra>
